<compile_context>
chip_gen: v7x
topology: tpu7x:2x2x1
jax: 0.10.0
libtpu: 0.0.40
codegen_flags: <defaults>
</compile_context>

<pallas_src>
import functools

import jax
import jax.numpy as jnp
import numpy as np
from jax.experimental import pallas as pl
from jax.experimental.pallas import tpu as pltpu


_TAPS = tuple((kh - 1, kw - 1) for kh in range(3) for kw in range(3))


def _round_up(x, m):
    return (x + m - 1) // m * m


# ----------------------------- host-side constants ---------------------------

def _tap_masks(h_size, w_size, p):
    """(9, 1, p) f32 per-tap source-validity mask over the flattened (and
    lane-padded) spatial axis. Implements the zero-padding halo."""
    m = np.zeros((9, 1, p), np.float32)
    hh = np.arange(h_size)[:, None]
    ww = np.arange(w_size)[None, :]
    for t, (dh, dw) in enumerate(_TAPS):
        valid = ((hh + dh >= 0) & (hh + dh < h_size) &
                 (ww + dw >= 0) & (ww + dw < w_size))
        m[t, 0, :h_size * w_size] = valid.reshape(-1)
    return jnp.asarray(m)


def _subsample_matrix(h_size, w_size, stride, p_in, p_out):
    """(p_in, p_out) one-hot matrix: output column q selects source pixel
    (stride*qh, stride*qw); lane-padding columns are all-zero."""
    ho = (h_size - 1) // stride + 1
    wo = (w_size - 1) // stride + 1
    sel = np.zeros((p_in, p_out), np.float32)
    qh, qw = np.meshgrid(np.arange(ho), np.arange(wo), indexing="ij")
    src = (stride * qh * w_size + stride * qw).reshape(-1)
    sel[src, np.arange(ho * wo)] = 1.0
    return jnp.asarray(sel)


# --------------------------------- kernel ------------------------------------

def _conv3x3_taps(x, w_ref, m_ref, width):
    """3x3 / stride-1 / zero-pad-1 conv on a flattened-spatial operand.

    x      : (Cin, P)       activations, spatial flattened onto the lane axis
    w_ref  : (9, Cout, Cin)  one MXU matrix per kernel tap
    m_ref  : (9, 1, P)       per-tap validity mask (padding halo + roll wrap)
    width  : W of the spatial grid that was flattened into the P lanes
    """
    cout = w_ref.shape[1]
    p = x.shape[1]
    acc = jnp.zeros((cout, p), jnp.float32)
    for t, (dh, dw) in enumerate(_TAPS):
        off = dh * width + dw
        # shifted[:, q] = x[:, q + off]; wrapped/halo positions zeroed by mask.
        xt = x if off == 0 else pltpu.roll(x, (-off) % p, 1)
        xt = xt * m_ref[t]
        # Repeated dot-accumulate into one f32 accumulator (MRB-friendly, and
        # avoids building an unaligned (9*Cin, P) im2col concat at small Cin).
        acc = acc + jnp.dot(w_ref[t], xt, preferred_element_type=jnp.float32)
    return acc


def _basic_block_kernel(*refs, width, width_out, stride, downsample):
    it = iter(refs)
    x_ref = next(it)
    w1_ref, s1_ref, b1_ref, m1_ref = next(it), next(it), next(it), next(it)
    w2_ref, s2_ref, b2_ref, m2_ref = next(it), next(it), next(it), next(it)
    sel_ref = next(it) if stride > 1 else None
    if downsample:
        wd_ref, sd_ref, bd_ref = next(it), next(it), next(it)
    o_ref = next(it)

    x = x_ref[...].astype(jnp.float32)                        # (Cin, P1)

    # conv1 -> BN1 -> ReLU (full resolution; stays in vregs/VMEM, never in HBM).
    h = _conv3x3_taps(x, w1_ref, m1_ref, width)               # (Cmid, P1)
    h = jnp.maximum(h * s1_ref[...] + b1_ref[...], 0.0)

    # Stride: one-hot column-selection matmul on the MXU (no lane gather).
    if stride > 1:
        h = jnp.dot(h, sel_ref[...], preferred_element_type=jnp.float32)

    # conv2 -> BN2.
    out = _conv3x3_taps(h, w2_ref, m2_ref, width_out)         # (Cout, P2)
    out = out * s2_ref[...] + b2_ref[...]

    # Residual branch, fused (identity, or 1x1 conv + BN with stride).
    if downsample:
        xs = x
        if stride > 1:
            xs = jnp.dot(x, sel_ref[...], preferred_element_type=jnp.float32)
        res = jnp.dot(wd_ref[...], xs, preferred_element_type=jnp.float32)
        res = res * sd_ref[...] + bd_ref[...]
    else:
        res = x

    # Lane-dense (multiple-of-128) unmasked store.
    o_ref[...] = jnp.maximum(out + res, 0.0).astype(o_ref.dtype)


# ------------------------------ pallas_call wrapper ---------------------------

def fused_basic_block(x_nchw, *, w1, s1, b1, w2, s2, b2, stride,
                      wd=None, sd=None, bd=None):
    n, cin, h_size, w_size = x_nchw.shape
    cmid = w1.shape[1]
    cout = w2.shape[1]
    ho = (h_size - 1) // stride + 1
    wo = (w_size - 1) // stride + 1
    p1 = _round_up(h_size * w_size, 128)
    p2 = _round_up(ho * wo, 128)
    downsample = wd is not None

    # NCHW -> (N, C, H*W): layout-preserving reshape; spatial goes on lanes.
    x_flat = x_nchw.reshape(n, cin, h_size * w_size).astype(jnp.float32)
    if p1 != h_size * w_size:
        x_flat = jnp.pad(x_flat, ((0, 0), (0, 0), (0, p1 - h_size * w_size)))

    m1 = _tap_masks(h_size, w_size, p1)
    m2 = _tap_masks(ho, wo, p2)

    inputs = [x_flat, w1, s1, b1, m1, w2, s2, b2, m2]
    in_specs = [
        pl.BlockSpec((None, cin, p1), lambda i: (i, 0, 0)),
        pl.BlockSpec((9, cmid, cin), lambda i: (0, 0, 0)),
        pl.BlockSpec((cmid, 1), lambda i: (0, 0)),
        pl.BlockSpec((cmid, 1), lambda i: (0, 0)),
        pl.BlockSpec((9, 1, p1), lambda i: (0, 0, 0)),
        pl.BlockSpec((9, cout, cmid), lambda i: (0, 0, 0)),
        pl.BlockSpec((cout, 1), lambda i: (0, 0)),
        pl.BlockSpec((cout, 1), lambda i: (0, 0)),
        pl.BlockSpec((9, 1, p2), lambda i: (0, 0, 0)),
    ]
    if stride > 1:
        inputs.append(_subsample_matrix(h_size, w_size, stride, p1, p2))
        in_specs.append(pl.BlockSpec((p1, p2), lambda i: (0, 0)))
    if downsample:
        inputs += [wd, sd, bd]
        in_specs += [
            pl.BlockSpec((cout, cin), lambda i: (0, 0)),
            pl.BlockSpec((cout, 1), lambda i: (0, 0)),
            pl.BlockSpec((cout, 1), lambda i: (0, 0)),
        ]

    kernel = functools.partial(_basic_block_kernel, width=w_size, width_out=wo,
                               stride=stride, downsample=downsample)

    out = pl.pallas_call(
        kernel,
        out_shape=jax.ShapeDtypeStruct((n, cout, p2), jnp.float32),
        grid=(n,),
        in_specs=in_specs,
        out_specs=pl.BlockSpec((None, cout, p2), lambda i: (i, 0, 0)),
        compiler_params=pltpu.CompilerParams(
            dimension_semantics=("parallel",)),   # batch splits across TCs
    )(*inputs)

    # Drop lane padding and restore NCHW (tiny / free host-side ops).
    return out[:, :, :ho * wo].reshape(n, cout, ho, wo)


# ------------------------------ parameter setup -------------------------------

def _bn_raw_params(keys, c):
    gamma = 1.0 + 0.1 * jax.random.normal(keys[0], (c,), jnp.float32)
    beta = 0.1 * jax.random.normal(keys[1], (c,), jnp.float32)
    mean = 0.1 * jax.random.normal(keys[2], (c,), jnp.float32)
    var = jnp.abs(jax.random.normal(keys[3], (c,), jnp.float32)) + 0.5
    return gamma, beta, mean, var


def _fold_bn(gamma, beta, mean, var, eps=1e-5):
    scale = gamma / jnp.sqrt(var + eps)
    bias = beta - mean * scale
    return scale.reshape(-1, 1), bias.reshape(-1, 1)


class BasicBlock:
    multiplier = 1

    def __init__(self, key, input_num_planes, num_planes, strd=1):
        cin, cmid = input_num_planes, num_planes
        cout = self.multiplier * num_planes
        ks = jax.random.split(key, 12)
        # conv weights created in PyTorch OIHW layout.
        w1 = 0.1 * jax.random.normal(ks[0], (cmid, cin, 3, 3), jnp.float32)
        w2 = 0.1 * jax.random.normal(ks[1], (cmid, cmid, 3, 3), jnp.float32)
        # HWIO copies for the pure-JAX reference.
        self.w1_hwio = jnp.transpose(w1, (2, 3, 1, 0))
        self.w2_hwio = jnp.transpose(w2, (2, 3, 1, 0))
        # Kernel layout: (9, Cout, Cin) -> one (Cout, Cin) MXU matrix per tap.
        self.w1_taps = jnp.transpose(w1, (2, 3, 0, 1)).reshape(9, cmid, cin)
        self.w2_taps = jnp.transpose(w2, (2, 3, 0, 1)).reshape(9, cmid, cmid)
        self.scale1, self.bias1 = _fold_bn(*_bn_raw_params(ks[2:6], cmid))
        self.scale2, self.bias2 = _fold_bn(*_bn_raw_params(ks[6:10], cmid))
        self.strd = strd
        self.downsample = strd > 1 or cin != cout
        if self.downsample:
            wd = 0.1 * jax.random.normal(ks[10], (cout, cin, 1, 1), jnp.float32)
            self.wd_hwio = jnp.transpose(wd, (2, 3, 1, 0))
            self.wd = wd.reshape(cout, cin)
            self.scaled, self.biasd = _fold_bn(
                *_bn_raw_params(jax.random.split(ks[11], 4), cout))

    def __call__(self, x_nchw):
        return fused_basic_block(
            x_nchw, w1=self.w1_taps, s1=self.scale1, b1=self.bias1,
            w2=self.w2_taps, s2=self.scale2, b2=self.bias2, stride=self.strd,
            wd=self.wd if self.downsample else None,
            sd=self.scaled if self.downsample else None,
            bd=self.biasd if self.downsample else None)


# ------------------------------ pure-JAX reference ----------------------------

def ref_basic_block(x_nchw, blk):
    dn = ('NHWC', 'HWIO', 'NHWC')
    s = blk.strd
    x = jnp.transpose(x_nchw, (0, 2, 3, 1)).astype(jnp.float32)
    op = jax.lax.conv_general_dilated(x, blk.w1_hwio, (s, s), ((1, 1), (1, 1)),
                                      dimension_numbers=dn)
    op = jax.nn.relu(op * blk.scale1.reshape(1, 1, 1, -1)
                     + blk.bias1.reshape(1, 1, 1, -1))
    op = jax.lax.conv_general_dilated(op, blk.w2_hwio, (1, 1), ((1, 1), (1, 1)),
                                      dimension_numbers=dn)
    op = op * blk.scale2.reshape(1, 1, 1, -1) + blk.bias2.reshape(1, 1, 1, -1)
    if blk.downsample:
        res = jax.lax.conv_general_dilated(x, blk.wd_hwio, (s, s),
                                           ((0, 0), (0, 0)),
                                           dimension_numbers=dn)
        res = res * blk.scaled.reshape(1, 1, 1, -1) + blk.biasd.reshape(1, 1, 1, -1)
    else:
        res = x
    out = jax.nn.relu(op + res)
    return jnp.transpose(out, (0, 3, 1, 2))


# ----------------------------------- main --------------------------------------

if __name__ == "__main__":
    key = jax.random.PRNGKey(0)
    kx, k1, k2 = jax.random.split(key, 3)
    x = jax.random.normal(kx, (2, 4, 16, 16), jnp.float32)   # NCHW, like PyTorch

    # Case 1: identity residual (strd=1, in_planes == planes).
    blk1 = BasicBlock(k1, 4, 4, strd=1)
    out1 = jax.block_until_ready(blk1(x))
    ref1 = ref_basic_block(x, blk1)
    assert out1.shape == (2, 4, 16, 16)
    assert jnp.allclose(out1, ref1, atol=1e-4, rtol=1e-4)

    # Case 2: downsample residual (strd=2, channel expansion 4 -> 8).
    blk2 = BasicBlock(k2, 4, 8, strd=2)
    out2 = jax.block_until_ready(blk2(x))
    ref2 = ref_basic_block(x, blk2)
    assert out2.shape == (2, 8, 8, 8)
    assert jnp.allclose(out2, ref2, atol=1e-4, rtol=1e-4)

    print("KERNEL_OK")
</pallas_src>

<mosaic_0001>
module attributes {stable_mosaic.version = 11 : i64} {
  func.func @_basic_block_kernel(%arg0: i32, %arg1: memref<1x4x256xf32, #tpu.memory_space<vmem>>, %arg2: memref<9x4x4xf32, #tpu.memory_space<vmem>>, %arg3: memref<4x1xf32, #tpu.memory_space<vmem>>, %arg4: memref<4x1xf32, #tpu.memory_space<vmem>>, %arg5: memref<9x1x256xf32, #tpu.memory_space<vmem>>, %arg6: memref<9x4x4xf32, #tpu.memory_space<vmem>>, %arg7: memref<4x1xf32, #tpu.memory_space<vmem>>, %arg8: memref<4x1xf32, #tpu.memory_space<vmem>>, %arg9: memref<9x1x256xf32, #tpu.memory_space<vmem>>, %arg10: memref<1x4x256xf32, #tpu.memory_space<vmem>>) attributes {dimension_semantics = [#tpu.dimension_semantics<parallel>], iteration_bounds = array<i64: 2>, scalar_prefetch = 0 : i64, scratch_operands = 0 : i64, tpu.core_type = #tpu.core_type<tc>, window_params = [{transform_indices = @transform_0, window_bounds = array<i64: 1, 4, 256>}, {pipeline_mode = #tpu.pipeline_mode<synchronous>, transform_indices = @transform_1, window_bounds = array<i64: 9, 4, 4>}, {pipeline_mode = #tpu.pipeline_mode<synchronous>, transform_indices = @transform_2, window_bounds = array<i64: 4, 1>}, {pipeline_mode = #tpu.pipeline_mode<synchronous>, transform_indices = @transform_3, window_bounds = array<i64: 4, 1>}, {pipeline_mode = #tpu.pipeline_mode<synchronous>, transform_indices = @transform_4, window_bounds = array<i64: 9, 1, 256>}, {pipeline_mode = #tpu.pipeline_mode<synchronous>, transform_indices = @transform_5, window_bounds = array<i64: 9, 4, 4>}, {pipeline_mode = #tpu.pipeline_mode<synchronous>, transform_indices = @transform_6, window_bounds = array<i64: 4, 1>}, {pipeline_mode = #tpu.pipeline_mode<synchronous>, transform_indices = @transform_7, window_bounds = array<i64: 4, 1>}, {pipeline_mode = #tpu.pipeline_mode<synchronous>, transform_indices = @transform_8, window_bounds = array<i64: 9, 1, 256>}, {transform_indices = @transform_9, window_bounds = array<i64: 1, 4, 256>}]} {
    %c0 = arith.constant 0 : index
    %c0_0 = arith.constant 0 : index
    %c0_1 = arith.constant 0 : index
    %0 = vector.load %arg1[%c0, %c0_0, %c0_1] : memref<1x4x256xf32, #tpu.memory_space<vmem>>, vector<1x4x256xf32>
    %1 = vector.shape_cast %0 : vector<1x4x256xf32> to vector<4x256xf32>
    %cst = arith.constant 0.000000e+00 : f32
    %2 = vector.broadcast %cst : f32 to vector<4x256xf32>
    %c17_i32 = arith.constant 17 : i32
    %3 = tpu.dynamic_rotate %1 by %c17_i32 dim 1 : vector<4x256xf32>, i32 -> vector<4x256xf32>
    %c0_2 = arith.constant 0 : index
    %c0_3 = arith.constant 0 : index
    %c0_4 = arith.constant 0 : index
    %4 = vector.load %arg5[%c0_2, %c0_3, %c0_4] : memref<9x1x256xf32, #tpu.memory_space<vmem>>, vector<1x1x256xf32>
    %5 = vector.shape_cast %4 : vector<1x1x256xf32> to vector<1x256xf32>
    %6 = vector.broadcast %5 : vector<1x256xf32> to vector<4x256xf32>
    %7 = arith.mulf %3, %6 : vector<4x256xf32>
    %c0_5 = arith.constant 0 : index
    %c0_6 = arith.constant 0 : index
    %c0_7 = arith.constant 0 : index
    %8 = vector.load %arg2[%c0_5, %c0_6, %c0_7] : memref<9x4x4xf32, #tpu.memory_space<vmem>>, vector<1x4x4xf32>
    %9 = vector.shape_cast %8 : vector<1x4x4xf32> to vector<4x4xf32>
    %cst_8 = arith.constant dense<0.000000e+00> : vector<4x256xf32>
    %10 = tpu.matmul %9, %7, %cst_8 {dimension_numbers = #tpu.dot_dimension_numbers<[1], [0], [0], [1], [0, 0, 1, 1], [], []>} : vector<4x4xf32>, vector<4x256xf32>, vector<4x256xf32> -> vector<4x256xf32>
    %11 = arith.addf %2, %10 : vector<4x256xf32>
    %c16_i32 = arith.constant 16 : i32
    %12 = tpu.dynamic_rotate %1 by %c16_i32 dim 1 : vector<4x256xf32>, i32 -> vector<4x256xf32>
    %c1 = arith.constant 1 : index
    %c0_9 = arith.constant 0 : index
    %c0_10 = arith.constant 0 : index
    %13 = vector.load %arg5[%c1, %c0_9, %c0_10] : memref<9x1x256xf32, #tpu.memory_space<vmem>>, vector<1x1x256xf32>
    %14 = vector.shape_cast %13 : vector<1x1x256xf32> to vector<1x256xf32>
    %15 = vector.broadcast %14 : vector<1x256xf32> to vector<4x256xf32>
    %16 = arith.mulf %12, %15 : vector<4x256xf32>
    %c1_11 = arith.constant 1 : index
    %c0_12 = arith.constant 0 : index
    %c0_13 = arith.constant 0 : index
    %17 = vector.load %arg2[%c1_11, %c0_12, %c0_13] : memref<9x4x4xf32, #tpu.memory_space<vmem>>, vector<1x4x4xf32>
    %18 = vector.shape_cast %17 : vector<1x4x4xf32> to vector<4x4xf32>
    %cst_14 = arith.constant dense<0.000000e+00> : vector<4x256xf32>
    %19 = tpu.matmul %18, %16, %cst_14 {dimension_numbers = #tpu.dot_dimension_numbers<[1], [0], [0], [1], [0, 0, 1, 1], [], []>} : vector<4x4xf32>, vector<4x256xf32>, vector<4x256xf32> -> vector<4x256xf32>
    %20 = arith.addf %11, %19 : vector<4x256xf32>
    %c15_i32 = arith.constant 15 : i32
    %21 = tpu.dynamic_rotate %1 by %c15_i32 dim 1 : vector<4x256xf32>, i32 -> vector<4x256xf32>
    %c2 = arith.constant 2 : index
    %c0_15 = arith.constant 0 : index
    %c0_16 = arith.constant 0 : index
    %22 = vector.load %arg5[%c2, %c0_15, %c0_16] : memref<9x1x256xf32, #tpu.memory_space<vmem>>, vector<1x1x256xf32>
    %23 = vector.shape_cast %22 : vector<1x1x256xf32> to vector<1x256xf32>
    %24 = vector.broadcast %23 : vector<1x256xf32> to vector<4x256xf32>
    %25 = arith.mulf %21, %24 : vector<4x256xf32>
    %c2_17 = arith.constant 2 : index
    %c0_18 = arith.constant 0 : index
    %c0_19 = arith.constant 0 : index
    %26 = vector.load %arg2[%c2_17, %c0_18, %c0_19] : memref<9x4x4xf32, #tpu.memory_space<vmem>>, vector<1x4x4xf32>
    %27 = vector.shape_cast %26 : vector<1x4x4xf32> to vector<4x4xf32>
    %cst_20 = arith.constant dense<0.000000e+00> : vector<4x256xf32>
    %28 = tpu.matmul %27, %25, %cst_20 {dimension_numbers = #tpu.dot_dimension_numbers<[1], [0], [0], [1], [0, 0, 1, 1], [], []>} : vector<4x4xf32>, vector<4x256xf32>, vector<4x256xf32> -> vector<4x256xf32>
    %29 = arith.addf %20, %28 : vector<4x256xf32>
    %c1_i32 = arith.constant 1 : i32
    %30 = tpu.dynamic_rotate %1 by %c1_i32 dim 1 : vector<4x256xf32>, i32 -> vector<4x256xf32>
    %c3 = arith.constant 3 : index
    %c0_21 = arith.constant 0 : index
    %c0_22 = arith.constant 0 : index
    %31 = vector.load %arg5[%c3, %c0_21, %c0_22] : memref<9x1x256xf32, #tpu.memory_space<vmem>>, vector<1x1x256xf32>
    %32 = vector.shape_cast %31 : vector<1x1x256xf32> to vector<1x256xf32>
    %33 = vector.broadcast %32 : vector<1x256xf32> to vector<4x256xf32>
    %34 = arith.mulf %30, %33 : vector<4x256xf32>
    %c3_23 = arith.constant 3 : index
    %c0_24 = arith.constant 0 : index
    %c0_25 = arith.constant 0 : index
    %35 = vector.load %arg2[%c3_23, %c0_24, %c0_25] : memref<9x4x4xf32, #tpu.memory_space<vmem>>, vector<1x4x4xf32>
    %36 = vector.shape_cast %35 : vector<1x4x4xf32> to vector<4x4xf32>
    %cst_26 = arith.constant dense<0.000000e+00> : vector<4x256xf32>
    %37 = tpu.matmul %36, %34, %cst_26 {dimension_numbers = #tpu.dot_dimension_numbers<[1], [0], [0], [1], [0, 0, 1, 1], [], []>} : vector<4x4xf32>, vector<4x256xf32>, vector<4x256xf32> -> vector<4x256xf32>
    %38 = arith.addf %29, %37 : vector<4x256xf32>
    %c4 = arith.constant 4 : index
    %c0_27 = arith.constant 0 : index
    %c0_28 = arith.constant 0 : index
    %39 = vector.load %arg5[%c4, %c0_27, %c0_28] : memref<9x1x256xf32, #tpu.memory_space<vmem>>, vector<1x1x256xf32>
    %40 = vector.shape_cast %39 : vector<1x1x256xf32> to vector<1x256xf32>
    %41 = vector.broadcast %40 : vector<1x256xf32> to vector<4x256xf32>
    %42 = arith.mulf %1, %41 : vector<4x256xf32>
    %c4_29 = arith.constant 4 : index
    %c0_30 = arith.constant 0 : index
    %c0_31 = arith.constant 0 : index
    %43 = vector.load %arg2[%c4_29, %c0_30, %c0_31] : memref<9x4x4xf32, #tpu.memory_space<vmem>>, vector<1x4x4xf32>
    %44 = vector.shape_cast %43 : vector<1x4x4xf32> to vector<4x4xf32>
    %cst_32 = arith.constant dense<0.000000e+00> : vector<4x256xf32>
    %45 = tpu.matmul %44, %42, %cst_32 {dimension_numbers = #tpu.dot_dimension_numbers<[1], [0], [0], [1], [0, 0, 1, 1], [], []>} : vector<4x4xf32>, vector<4x256xf32>, vector<4x256xf32> -> vector<4x256xf32>
    %46 = arith.addf %38, %45 : vector<4x256xf32>
    %c255_i32 = arith.constant 255 : i32
    %47 = tpu.dynamic_rotate %1 by %c255_i32 dim 1 : vector<4x256xf32>, i32 -> vector<4x256xf32>
    %c5 = arith.constant 5 : index
    %c0_33 = arith.constant 0 : index
    %c0_34 = arith.constant 0 : index
    %48 = vector.load %arg5[%c5, %c0_33, %c0_34] : memref<9x1x256xf32, #tpu.memory_space<vmem>>, vector<1x1x256xf32>
    %49 = vector.shape_cast %48 : vector<1x1x256xf32> to vector<1x256xf32>
    %50 = vector.broadcast %49 : vector<1x256xf32> to vector<4x256xf32>
    %51 = arith.mulf %47, %50 : vector<4x256xf32>
    %c5_35 = arith.constant 5 : index
    %c0_36 = arith.constant 0 : index
    %c0_37 = arith.constant 0 : index
    %52 = vector.load %arg2[%c5_35, %c0_36, %c0_37] : memref<9x4x4xf32, #tpu.memory_space<vmem>>, vector<1x4x4xf32>
    %53 = vector.shape_cast %52 : vector<1x4x4xf32> to vector<4x4xf32>
    %cst_38 = arith.constant dense<0.000000e+00> : vector<4x256xf32>
    %54 = tpu.matmul %53, %51, %cst_38 {dimension_numbers = #tpu.dot_dimension_numbers<[1], [0], [0], [1], [0, 0, 1, 1], [], []>} : vector<4x4xf32>, vector<4x256xf32>, vector<4x256xf32> -> vector<4x256xf32>
    %55 = arith.addf %46, %54 : vector<4x256xf32>
    %c241_i32 = arith.constant 241 : i32
    %56 = tpu.dynamic_rotate %1 by %c241_i32 dim 1 : vector<4x256xf32>, i32 -> vector<4x256xf32>
    %c6 = arith.constant 6 : index
    %c0_39 = arith.constant 0 : index
    %c0_40 = arith.constant 0 : index
    %57 = vector.load %arg5[%c6, %c0_39, %c0_40] : memref<9x1x256xf32, #tpu.memory_space<vmem>>, vector<1x1x256xf32>
    %58 = vector.shape_cast %57 : vector<1x1x256xf32> to vector<1x256xf32>
    %59 = vector.broadcast %58 : vector<1x256xf32> to vector<4x256xf32>
    %60 = arith.mulf %56, %59 : vector<4x256xf32>
    %c6_41 = arith.constant 6 : index
    %c0_42 = arith.constant 0 : index
    %c0_43 = arith.constant 0 : index
    %61 = vector.load %arg2[%c6_41, %c0_42, %c0_43] : memref<9x4x4xf32, #tpu.memory_space<vmem>>, vector<1x4x4xf32>
    %62 = vector.shape_cast %61 : vector<1x4x4xf32> to vector<4x4xf32>
    %cst_44 = arith.constant dense<0.000000e+00> : vector<4x256xf32>
    %63 = tpu.matmul %62, %60, %cst_44 {dimension_numbers = #tpu.dot_dimension_numbers<[1], [0], [0], [1], [0, 0, 1, 1], [], []>} : vector<4x4xf32>, vector<4x256xf32>, vector<4x256xf32> -> vector<4x256xf32>
    %64 = arith.addf %55, %63 : vector<4x256xf32>
    %c240_i32 = arith.constant 240 : i32
    %65 = tpu.dynamic_rotate %1 by %c240_i32 dim 1 : vector<4x256xf32>, i32 -> vector<4x256xf32>
    %c7 = arith.constant 7 : index
    %c0_45 = arith.constant 0 : index
    %c0_46 = arith.constant 0 : index
    %66 = vector.load %arg5[%c7, %c0_45, %c0_46] : memref<9x1x256xf32, #tpu.memory_space<vmem>>, vector<1x1x256xf32>
    %67 = vector.shape_cast %66 : vector<1x1x256xf32> to vector<1x256xf32>
    %68 = vector.broadcast %67 : vector<1x256xf32> to vector<4x256xf32>
    %69 = arith.mulf %65, %68 : vector<4x256xf32>
    %c7_47 = arith.constant 7 : index
    %c0_48 = arith.constant 0 : index
    %c0_49 = arith.constant 0 : index
    %70 = vector.load %arg2[%c7_47, %c0_48, %c0_49] : memref<9x4x4xf32, #tpu.memory_space<vmem>>, vector<1x4x4xf32>
    %71 = vector.shape_cast %70 : vector<1x4x4xf32> to vector<4x4xf32>
    %cst_50 = arith.constant dense<0.000000e+00> : vector<4x256xf32>
    %72 = tpu.matmul %71, %69, %cst_50 {dimension_numbers = #tpu.dot_dimension_numbers<[1], [0], [0], [1], [0, 0, 1, 1], [], []>} : vector<4x4xf32>, vector<4x256xf32>, vector<4x256xf32> -> vector<4x256xf32>
    %73 = arith.addf %64, %72 : vector<4x256xf32>
    %c239_i32 = arith.constant 239 : i32
    %74 = tpu.dynamic_rotate %1 by %c239_i32 dim 1 : vector<4x256xf32>, i32 -> vector<4x256xf32>
    %c8 = arith.constant 8 : index
    %c0_51 = arith.constant 0 : index
    %c0_52 = arith.constant 0 : index
    %75 = vector.load %arg5[%c8, %c0_51, %c0_52] : memref<9x1x256xf32, #tpu.memory_space<vmem>>, vector<1x1x256xf32>
    %76 = vector.shape_cast %75 : vector<1x1x256xf32> to vector<1x256xf32>
    %77 = vector.broadcast %76 : vector<1x256xf32> to vector<4x256xf32>
    %78 = arith.mulf %74, %77 : vector<4x256xf32>
    %c8_53 = arith.constant 8 : index
    %c0_54 = arith.constant 0 : index
    %c0_55 = arith.constant 0 : index
    %79 = vector.load %arg2[%c8_53, %c0_54, %c0_55] : memref<9x4x4xf32, #tpu.memory_space<vmem>>, vector<1x4x4xf32>
    %80 = vector.shape_cast %79 : vector<1x4x4xf32> to vector<4x4xf32>
    %cst_56 = arith.constant dense<0.000000e+00> : vector<4x256xf32>
    %81 = tpu.matmul %80, %78, %cst_56 {dimension_numbers = #tpu.dot_dimension_numbers<[1], [0], [0], [1], [0, 0, 1, 1], [], []>} : vector<4x4xf32>, vector<4x256xf32>, vector<4x256xf32> -> vector<4x256xf32>
    %82 = arith.addf %73, %81 : vector<4x256xf32>
    %c0_57 = arith.constant 0 : index
    %c0_58 = arith.constant 0 : index
    %83 = vector.load %arg3[%c0_57, %c0_58] : memref<4x1xf32, #tpu.memory_space<vmem>>, vector<4x1xf32>
    %84 = vector.broadcast %83 : vector<4x1xf32> to vector<4x256xf32>
    %85 = arith.mulf %82, %84 : vector<4x256xf32>
    %c0_59 = arith.constant 0 : index
    %c0_60 = arith.constant 0 : index
    %86 = vector.load %arg4[%c0_59, %c0_60] : memref<4x1xf32, #tpu.memory_space<vmem>>, vector<4x1xf32>
    %87 = vector.broadcast %86 : vector<4x1xf32> to vector<4x256xf32>
    %88 = arith.addf %85, %87 : vector<4x256xf32>
    %cst_61 = arith.constant 0.000000e+00 : f32
    %89 = vector.broadcast %cst_61 : f32 to vector<4x256xf32>
    %90 = arith.maximumf %88, %89 : vector<4x256xf32>
    %cst_62 = arith.constant 0.000000e+00 : f32
    %91 = vector.broadcast %cst_62 : f32 to vector<4x256xf32>
    %c17_i32_63 = arith.constant 17 : i32
    %92 = tpu.dynamic_rotate %90 by %c17_i32_63 dim 1 : vector<4x256xf32>, i32 -> vector<4x256xf32>
    %c0_64 = arith.constant 0 : index
    %c0_65 = arith.constant 0 : index
    %c0_66 = arith.constant 0 : index
    %93 = vector.load %arg9[%c0_64, %c0_65, %c0_66] : memref<9x1x256xf32, #tpu.memory_space<vmem>>, vector<1x1x256xf32>
    %94 = vector.shape_cast %93 : vector<1x1x256xf32> to vector<1x256xf32>
    %95 = vector.broadcast %94 : vector<1x256xf32> to vector<4x256xf32>
    %96 = arith.mulf %92, %95 : vector<4x256xf32>
    %c0_67 = arith.constant 0 : index
    %c0_68 = arith.constant 0 : index
    %c0_69 = arith.constant 0 : index
    %97 = vector.load %arg6[%c0_67, %c0_68, %c0_69] : memref<9x4x4xf32, #tpu.memory_space<vmem>>, vector<1x4x4xf32>
    %98 = vector.shape_cast %97 : vector<1x4x4xf32> to vector<4x4xf32>
    %cst_70 = arith.constant dense<0.000000e+00> : vector<4x256xf32>
    %99 = tpu.matmul %98, %96, %cst_70 {dimension_numbers = #tpu.dot_dimension_numbers<[1], [0], [0], [1], [0, 0, 1, 1], [], []>} : vector<4x4xf32>, vector<4x256xf32>, vector<4x256xf32> -> vector<4x256xf32>
    %100 = arith.addf %91, %99 : vector<4x256xf32>
    %c16_i32_71 = arith.constant 16 : i32
    %101 = tpu.dynamic_rotate %90 by %c16_i32_71 dim 1 : vector<4x256xf32>, i32 -> vector<4x256xf32>
    %c1_72 = arith.constant 1 : index
    %c0_73 = arith.constant 0 : index
    %c0_74 = arith.constant 0 : index
    %102 = vector.load %arg9[%c1_72, %c0_73, %c0_74] : memref<9x1x256xf32, #tpu.memory_space<vmem>>, vector<1x1x256xf32>
    %103 = vector.shape_cast %102 : vector<1x1x256xf32> to vector<1x256xf32>
    %104 = vector.broadcast %103 : vector<1x256xf32> to vector<4x256xf32>
    %105 = arith.mulf %101, %104 : vector<4x256xf32>
    %c1_75 = arith.constant 1 : index
    %c0_76 = arith.constant 0 : index
    %c0_77 = arith.constant 0 : index
    %106 = vector.load %arg6[%c1_75, %c0_76, %c0_77] : memref<9x4x4xf32, #tpu.memory_space<vmem>>, vector<1x4x4xf32>
    %107 = vector.shape_cast %106 : vector<1x4x4xf32> to vector<4x4xf32>
    %cst_78 = arith.constant dense<0.000000e+00> : vector<4x256xf32>
    %108 = tpu.matmul %107, %105, %cst_78 {dimension_numbers = #tpu.dot_dimension_numbers<[1], [0], [0], [1], [0, 0, 1, 1], [], []>} : vector<4x4xf32>, vector<4x256xf32>, vector<4x256xf32> -> vector<4x256xf32>
    %109 = arith.addf %100, %108 : vector<4x256xf32>
    %c15_i32_79 = arith.constant 15 : i32
    %110 = tpu.dynamic_rotate %90 by %c15_i32_79 dim 1 : vector<4x256xf32>, i32 -> vector<4x256xf32>
    %c2_80 = arith.constant 2 : index
    %c0_81 = arith.constant 0 : index
    %c0_82 = arith.constant 0 : index
    %111 = vector.load %arg9[%c2_80, %c0_81, %c0_82] : memref<9x1x256xf32, #tpu.memory_space<vmem>>, vector<1x1x256xf32>
    %112 = vector.shape_cast %111 : vector<1x1x256xf32> to vector<1x256xf32>
    %113 = vector.broadcast %112 : vector<1x256xf32> to vector<4x256xf32>
    %114 = arith.mulf %110, %113 : vector<4x256xf32>
    %c2_83 = arith.constant 2 : index
    %c0_84 = arith.constant 0 : index
    %c0_85 = arith.constant 0 : index
    %115 = vector.load %arg6[%c2_83, %c0_84, %c0_85] : memref<9x4x4xf32, #tpu.memory_space<vmem>>, vector<1x4x4xf32>
    %116 = vector.shape_cast %115 : vector<1x4x4xf32> to vector<4x4xf32>
    %cst_86 = arith.constant dense<0.000000e+00> : vector<4x256xf32>
    %117 = tpu.matmul %116, %114, %cst_86 {dimension_numbers = #tpu.dot_dimension_numbers<[1], [0], [0], [1], [0, 0, 1, 1], [], []>} : vector<4x4xf32>, vector<4x256xf32>, vector<4x256xf32> -> vector<4x256xf32>
    %118 = arith.addf %109, %117 : vector<4x256xf32>
    %c1_i32_87 = arith.constant 1 : i32
    %119 = tpu.dynamic_rotate %90 by %c1_i32_87 dim 1 : vector<4x256xf32>, i32 -> vector<4x256xf32>
    %c3_88 = arith.constant 3 : index
    %c0_89 = arith.constant 0 : index
    %c0_90 = arith.constant 0 : index
    %120 = vector.load %arg9[%c3_88, %c0_89, %c0_90] : memref<9x1x256xf32, #tpu.memory_space<vmem>>, vector<1x1x256xf32>
    %121 = vector.shape_cast %120 : vector<1x1x256xf32> to vector<1x256xf32>
    %122 = vector.broadcast %121 : vector<1x256xf32> to vector<4x256xf32>
    %123 = arith.mulf %119, %122 : vector<4x256xf32>
    %c3_91 = arith.constant 3 : index
    %c0_92 = arith.constant 0 : index
    %c0_93 = arith.constant 0 : index
    %124 = vector.load %arg6[%c3_91, %c0_92, %c0_93] : memref<9x4x4xf32, #tpu.memory_space<vmem>>, vector<1x4x4xf32>
    %125 = vector.shape_cast %124 : vector<1x4x4xf32> to vector<4x4xf32>
    %cst_94 = arith.constant dense<0.000000e+00> : vector<4x256xf32>
    %126 = tpu.matmul %125, %123, %cst_94 {dimension_numbers = #tpu.dot_dimension_numbers<[1], [0], [0], [1], [0, 0, 1, 1], [], []>} : vector<4x4xf32>, vector<4x256xf32>, vector<4x256xf32> -> vector<4x256xf32>
    %127 = arith.addf %118, %126 : vector<4x256xf32>
    %c4_95 = arith.constant 4 : index
    %c0_96 = arith.constant 0 : index
    %c0_97 = arith.constant 0 : index
    %128 = vector.load %arg9[%c4_95, %c0_96, %c0_97] : memref<9x1x256xf32, #tpu.memory_space<vmem>>, vector<1x1x256xf32>
    %129 = vector.shape_cast %128 : vector<1x1x256xf32> to vector<1x256xf32>
    %130 = vector.broadcast %129 : vector<1x256xf32> to vector<4x256xf32>
    %131 = arith.mulf %90, %130 : vector<4x256xf32>
    %c4_98 = arith.constant 4 : index
    %c0_99 = arith.constant 0 : index
    %c0_100 = arith.constant 0 : index
    %132 = vector.load %arg6[%c4_98, %c0_99, %c0_100] : memref<9x4x4xf32, #tpu.memory_space<vmem>>, vector<1x4x4xf32>
    %133 = vector.shape_cast %132 : vector<1x4x4xf32> to vector<4x4xf32>
    %cst_101 = arith.constant dense<0.000000e+00> : vector<4x256xf32>
    %134 = tpu.matmul %133, %131, %cst_101 {dimension_numbers = #tpu.dot_dimension_numbers<[1], [0], [0], [1], [0, 0, 1, 1], [], []>} : vector<4x4xf32>, vector<4x256xf32>, vector<4x256xf32> -> vector<4x256xf32>
    %135 = arith.addf %127, %134 : vector<4x256xf32>
    %c255_i32_102 = arith.constant 255 : i32
    %136 = tpu.dynamic_rotate %90 by %c255_i32_102 dim 1 : vector<4x256xf32>, i32 -> vector<4x256xf32>
    %c5_103 = arith.constant 5 : index
    %c0_104 = arith.constant 0 : index
    %c0_105 = arith.constant 0 : index
    %137 = vector.load %arg9[%c5_103, %c0_104, %c0_105] : memref<9x1x256xf32, #tpu.memory_space<vmem>>, vector<1x1x256xf32>
    %138 = vector.shape_cast %137 : vector<1x1x256xf32> to vector<1x256xf32>
    %139 = vector.broadcast %138 : vector<1x256xf32> to vector<4x256xf32>
    %140 = arith.mulf %136, %139 : vector<4x256xf32>
    %c5_106 = arith.constant 5 : index
    %c0_107 = arith.constant 0 : index
    %c0_108 = arith.constant 0 : index
    %141 = vector.load %arg6[%c5_106, %c0_107, %c0_108] : memref<9x4x4xf32, #tpu.memory_space<vmem>>, vector<1x4x4xf32>
    %142 = vector.shape_cast %141 : vector<1x4x4xf32> to vector<4x4xf32>
    %cst_109 = arith.constant dense<0.000000e+00> : vector<4x256xf32>
    %143 = tpu.matmul %142, %140, %cst_109 {dimension_numbers = #tpu.dot_dimension_numbers<[1], [0], [0], [1], [0, 0, 1, 1], [], []>} : vector<4x4xf32>, vector<4x256xf32>, vector<4x256xf32> -> vector<4x256xf32>
    %144 = arith.addf %135, %143 : vector<4x256xf32>
    %c241_i32_110 = arith.constant 241 : i32
    %145 = tpu.dynamic_rotate %90 by %c241_i32_110 dim 1 : vector<4x256xf32>, i32 -> vector<4x256xf32>
    %c6_111 = arith.constant 6 : index
    %c0_112 = arith.constant 0 : index
    %c0_113 = arith.constant 0 : index
    %146 = vector.load %arg9[%c6_111, %c0_112, %c0_113] : memref<9x1x256xf32, #tpu.memory_space<vmem>>, vector<1x1x256xf32>
    %147 = vector.shape_cast %146 : vector<1x1x256xf32> to vector<1x256xf32>
    %148 = vector.broadcast %147 : vector<1x256xf32> to vector<4x256xf32>
    %149 = arith.mulf %145, %148 : vector<4x256xf32>
    %c6_114 = arith.constant 6 : index
    %c0_115 = arith.constant 0 : index
    %c0_116 = arith.constant 0 : index
    %150 = vector.load %arg6[%c6_114, %c0_115, %c0_116] : memref<9x4x4xf32, #tpu.memory_space<vmem>>, vector<1x4x4xf32>
    %151 = vector.shape_cast %150 : vector<1x4x4xf32> to vector<4x4xf32>
    %cst_117 = arith.constant dense<0.000000e+00> : vector<4x256xf32>
    %152 = tpu.matmul %151, %149, %cst_117 {dimension_numbers = #tpu.dot_dimension_numbers<[1], [0], [0], [1], [0, 0, 1, 1], [], []>} : vector<4x4xf32>, vector<4x256xf32>, vector<4x256xf32> -> vector<4x256xf32>
    %153 = arith.addf %144, %152 : vector<4x256xf32>
    %c240_i32_118 = arith.constant 240 : i32
    %154 = tpu.dynamic_rotate %90 by %c240_i32_118 dim 1 : vector<4x256xf32>, i32 -> vector<4x256xf32>
    %c7_119 = arith.constant 7 : index
    %c0_120 = arith.constant 0 : index
    %c0_121 = arith.constant 0 : index
    %155 = vector.load %arg9[%c7_119, %c0_120, %c0_121] : memref<9x1x256xf32, #tpu.memory_space<vmem>>, vector<1x1x256xf32>
    %156 = vector.shape_cast %155 : vector<1x1x256xf32> to vector<1x256xf32>
    %157 = vector.broadcast %156 : vector<1x256xf32> to vector<4x256xf32>
    %158 = arith.mulf %154, %157 : vector<4x256xf32>
    %c7_122 = arith.constant 7 : index
    %c0_123 = arith.constant 0 : index
    %c0_124 = arith.constant 0 : index
    %159 = vector.load %arg6[%c7_122, %c0_123, %c0_124] : memref<9x4x4xf32, #tpu.memory_space<vmem>>, vector<1x4x4xf32>
    %160 = vector.shape_cast %159 : vector<1x4x4xf32> to vector<4x4xf32>
    %cst_125 = arith.constant dense<0.000000e+00> : vector<4x256xf32>
    %161 = tpu.matmul %160, %158, %cst_125 {dimension_numbers = #tpu.dot_dimension_numbers<[1], [0], [0], [1], [0, 0, 1, 1], [], []>} : vector<4x4xf32>, vector<4x256xf32>, vector<4x256xf32> -> vector<4x256xf32>
    %162 = arith.addf %153, %161 : vector<4x256xf32>
    %c239_i32_126 = arith.constant 239 : i32
    %163 = tpu.dynamic_rotate %90 by %c239_i32_126 dim 1 : vector<4x256xf32>, i32 -> vector<4x256xf32>
    %c8_127 = arith.constant 8 : index
    %c0_128 = arith.constant 0 : index
    %c0_129 = arith.constant 0 : index
    %164 = vector.load %arg9[%c8_127, %c0_128, %c0_129] : memref<9x1x256xf32, #tpu.memory_space<vmem>>, vector<1x1x256xf32>
    %165 = vector.shape_cast %164 : vector<1x1x256xf32> to vector<1x256xf32>
    %166 = vector.broadcast %165 : vector<1x256xf32> to vector<4x256xf32>
    %167 = arith.mulf %163, %166 : vector<4x256xf32>
    %c8_130 = arith.constant 8 : index
    %c0_131 = arith.constant 0 : index
    %c0_132 = arith.constant 0 : index
    %168 = vector.load %arg6[%c8_130, %c0_131, %c0_132] : memref<9x4x4xf32, #tpu.memory_space<vmem>>, vector<1x4x4xf32>
    %169 = vector.shape_cast %168 : vector<1x4x4xf32> to vector<4x4xf32>
    %cst_133 = arith.constant dense<0.000000e+00> : vector<4x256xf32>
    %170 = tpu.matmul %169, %167, %cst_133 {dimension_numbers = #tpu.dot_dimension_numbers<[1], [0], [0], [1], [0, 0, 1, 1], [], []>} : vector<4x4xf32>, vector<4x256xf32>, vector<4x256xf32> -> vector<4x256xf32>
    %171 = arith.addf %162, %170 : vector<4x256xf32>
    %c0_134 = arith.constant 0 : index
    %c0_135 = arith.constant 0 : index
    %172 = vector.load %arg7[%c0_134, %c0_135] : memref<4x1xf32, #tpu.memory_space<vmem>>, vector<4x1xf32>
    %173 = vector.broadcast %172 : vector<4x1xf32> to vector<4x256xf32>
    %174 = arith.mulf %171, %173 : vector<4x256xf32>
    %c0_136 = arith.constant 0 : index
    %c0_137 = arith.constant 0 : index
    %175 = vector.load %arg8[%c0_136, %c0_137] : memref<4x1xf32, #tpu.memory_space<vmem>>, vector<4x1xf32>
    %176 = vector.broadcast %175 : vector<4x1xf32> to vector<4x256xf32>
    %177 = arith.addf %174, %176 : vector<4x256xf32>
    %178 = arith.addf %177, %1 : vector<4x256xf32>
    %cst_138 = arith.constant 0.000000e+00 : f32
    %179 = vector.broadcast %cst_138 : f32 to vector<4x256xf32>
    %180 = arith.maximumf %178, %179 : vector<4x256xf32>
    %c0_139 = arith.constant 0 : index
    %c0_140 = arith.constant 0 : index
    %c0_141 = arith.constant 0 : index
    %181 = vector.load %arg10[%c0_139, %c0_140, %c0_141] : memref<1x4x256xf32, #tpu.memory_space<vmem>>, vector<1x4x256xf32>
    %182 = vector.shape_cast %181 : vector<1x4x256xf32> to vector<4x256xf32>
    %183 = vector.shape_cast %180 : vector<4x256xf32> to vector<1x4x256xf32>
    tpu.vector_store %arg10[%c0_139, %c0_140, %c0_141], %183 {strides = array<i32>} : memref<1x4x256xf32, #tpu.memory_space<vmem>>, vector<1x4x256xf32>,
    return
  }
  func.func @transform_0(%arg0: i32) -> (i32, i32, i32) {
    %c0_i32 = arith.constant 0 : i32
    %c0_i32_0 = arith.constant 0 : i32
    %c0_i32_1 = arith.constant 0 : i32
    return %arg0, %c0_i32, %c0_i32_0 : i32, i32, i32
  }
  func.func @transform_1(%arg0: i32) -> (i32, i32, i32) {
    %c0_i32 = arith.constant 0 : i32
    %c0_i32_0 = arith.constant 0 : i32
    %c0_i32_1 = arith.constant 0 : i32
    %c0_i32_2 = arith.constant 0 : i32
    return %c0_i32, %c0_i32_0, %c0_i32_1 : i32, i32, i32
  }
  func.func @transform_2(%arg0: i32) -> (i32, i32) {
    %c0_i32 = arith.constant 0 : i32
    %c0_i32_0 = arith.constant 0 : i32
    %c0_i32_1 = arith.constant 0 : i32
    return %c0_i32, %c0_i32_0 : i32, i32
  }
  func.func @transform_3(%arg0: i32) -> (i32, i32) {
    %c0_i32 = arith.constant 0 : i32
    %c0_i32_0 = arith.constant 0 : i32
    %c0_i32_1 = arith.constant 0 : i32
    return %c0_i32, %c0_i32_0 : i32, i32
  }
  func.func @transform_4(%arg0: i32) -> (i32, i32, i32) {
    %c0_i32 = arith.constant 0 : i32
    %c0_i32_0 = arith.constant 0 : i32
    %c0_i32_1 = arith.constant 0 : i32
    %c0_i32_2 = arith.constant 0 : i32
    return %c0_i32, %c0_i32_0, %c0_i32_1 : i32, i32, i32
  }
  func.func @transform_5(%arg0: i32) -> (i32, i32, i32) {
    %c0_i32 = arith.constant 0 : i32
    %c0_i32_0 = arith.constant 0 : i32
    %c0_i32_1 = arith.constant 0 : i32
    %c0_i32_2 = arith.constant 0 : i32
    return %c0_i32, %c0_i32_0, %c0_i32_1 : i32, i32, i32
  }
  func.func @transform_6(%arg0: i32) -> (i32, i32) {
    %c0_i32 = arith.constant 0 : i32
    %c0_i32_0 = arith.constant 0 : i32
    %c0_i32_1 = arith.constant 0 : i32
    return %c0_i32, %c0_i32_0 : i32, i32
  }
  func.func @transform_7(%arg0: i32) -> (i32, i32) {
    %c0_i32 = arith.constant 0 : i32
    %c0_i32_0 = arith.constant 0 : i32
    %c0_i32_1 = arith.constant 0 : i32
    return %c0_i32, %c0_i32_0 : i32, i32
  }
  func.func @transform_8(%arg0: i32) -> (i32, i32, i32) {
    %c0_i32 = arith.constant 0 : i32
    %c0_i32_0 = arith.constant 0 : i32
    %c0_i32_1 = arith.constant 0 : i32
    %c0_i32_2 = arith.constant 0 : i32
    return %c0_i32, %c0_i32_0, %c0_i32_1 : i32, i32, i32
  }
  func.func @transform_9(%arg0: i32) -> (i32, i32, i32) {
    %c0_i32 = arith.constant 0 : i32
    %c0_i32_0 = arith.constant 0 : i32
    %c0_i32_1 = arith.constant 0 : i32
    return %arg0, %c0_i32, %c0_i32_0 : i32, i32, i32
  }
}

</mosaic_0001>

<bundles_post_ra>
// kernel: tpu_custom_call.1
= control target key start
LH: loop header
LB: loop body
LE: loop exit
PB: predicated region body
PF: predicated region fallthrough
CT: control target
= control target key end

     0   :  { %14 = vsyncpa [#allocation3], 0  ;;  %s3123_s0 = inlined_call_operand.vmem [shape: f32[2,4,256], index: 0, kind: input, shape index: {}]   ;;  %s3124_s1 = inlined_call_operand.vmem [shape: f32[9,4,4], index: 1, kind: input, shape index: {}]   ;;  %s3125_s2 = inlined_call_operand.vmem [shape: f32[4,1], index: 2, kind: input, shape index: {}]   ;;  %s3126_s3 = inlined_call_operand.vmem [shape: f32[4,1], index: 3, kind: input, shape index: {}]   ;;  %s3127_s4 = inlined_call_operand.vmem [shape: f32[9,1,256], index: 4, kind: input, shape index: {}]   ;;  %s3128_s5 = inlined_call_operand.vmem [shape: f32[9,4,4], index: 5, kind: input, shape index: {}]   ;;  %s3129_s6 = inlined_call_operand.vmem [shape: f32[4,1], index: 6, kind: input, shape index: {}]   ;;  %s3130_s7 = inlined_call_operand.vmem [shape: f32[4,1], index: 7, kind: input, shape index: {}]   ;;  %s3131_s8 = inlined_call_operand.vmem [shape: f32[9,1,256], index: 8, kind: input, shape index: {}]   ;;  %s3132_s9 = inlined_call_operand.hbm [shape: f32[2,4,256], index: 9, kind: output, shape index: {}]  }
   0x1   :  { %16 = vsyncpa [#allocation3 + $0x1], 0  ;;  %s2638_s30 = smov 0   ;;  %s2640_s10 = smov 0  }
   0x2   :  { %s2642_s11 = smov 0   ;;  %s2644_s12 = smov 0  }
   0x3 LB: > { %s2659_s13 = sadd.s32 4294967295, %s2575_s12   ;;  %s2329_s14 = sadd.s32 4294967294, %s2575_s12   ;;  %s2575_s12 = sphi %s2644_s12, %s3144_s12   ;;  %s2571_s11 = sphi %s2642_s11, %s3143_s11   ;;  %s2567_s10 = sphi %s2640_s10, %s3142_s10   ;;  %s2563_s30 = sphi %s2638_s30, %s3141_s30  }
   0x4   : > { %s2663_s15 = sadd.s32 1, %s2575_s12   ;;  %s223_s16 = sadd.s32 1, %s2571_s11 }
   0x5   : > { %s220_s17 = ssub.s32 %s2575_s12, %s2663_s15  ;;  %p233_p0 = scmp.ne.s32.totalorder %s2571_s11, %s2567_s10 }
   0x6   : > { %p221_p1 = scmp.eq.s32.totalorder %s220_s17, 0  ;;  %p234_p2 = scmp.eq.s32.totalorder %s2659_s13, 1 }
   0x7   : > { %p239_p3 = scmp.ne.s32.totalorder %s2567_s10, %s2563_s30  ;;  %p240_p4 = scmp.eq.s32.totalorder %s2329_s14, 1 }
   0x8   : > { %s2674_s18 = scalar_select %p221_p1, %s2571_s11, %s223_s16  }
   0x9   : > { %p2676_p5 = por %p234_p2, %p233_p0  ;;  %p2680_p6 = por %p240_p4, %p239_p3 }
   0xa   : > { %p2332_p7 = scmp.ge.s32.totalorder %s2575_s12, 1  ;;  %p290_p8 = scmp.lt.s32.totalorder %s2575_s12, 3 }
   0xc   : > { %p291_p9 = pnand %p2332_p7, %p290_p8 }
   0xd   : > { %p326_p10 = scmp.lt.s32.totalorder (!%p291_p9), %s2659_s13, 1  ;;  %v2577_v0 = vmov (!%p291_p9), 0.0   ;;  %s2578_s26 = smov (!%p291_p9), 17   ;;  %v1279_v3 = vld [vmem:[%s3125_s2] sm:$0xf] (!%p291_p9)  ;;  %v2586_v5 = vmov (!%p291_p9), 0   ;;  %v339_v6 = vlaneseq (!%p291_p9) }
   0xe   : > { %294 = sbr.rel (%p291_p9) target bundleno = 854 (0x356), region = 56  ;;  %458 = vmatprep.mubr.f32.mxu0 (!%p291_p9), %v2577_v0  ;;  %1414 = vmatprep.mubr.f32.mxu1 (!%p291_p9), %v2577_v0  ;;  %s2579_s27 = smov (!%p291_p9), 16   ;;  %v1287_v4 = vld [vmem:[%s3126_s3] sm:$0xf] (!%p291_p9)  ;;  %v2344_v19 = vld [vmem:[%s3127_s4 + $0x4] sm:$0x3] (!%p291_p9) }
   0xf   : > { %s2580_s28 = smov (!%p291_p9), 15   ;;  %s2581_s29 = smov (!%p291_p9), 1   ;;  %2510 = vset.pattern.permute.xlu0 (!%p291_p9), %v2586_v5  ;;  %2511 = vset.pattern.permute.xlu1 (!%p291_p9), %v2586_v5  ;;  %v347_v7 = vshrl.u32 (!%p291_p9), %v339_v6, 7  ;;  %v2737_v8 = vand.u32 (!%p291_p9), 127, %v339_v6  ;;  %v344_v11 = vld [vmem:[%s3127_s4] sm:$0x3] (!%p291_p9) }
  0x10   : > { %s2582_s14 = smov (!%p291_p9), 127   ;;  %s2583_s16 = smov (!%p291_p9), 113   ;;  %v2336_v12 = vld [vmem:[%s3127_s4 + $0x2] sm:$0x3] (!%p291_p9)  ;;  %vm387_vm2 = vcmask (!%p291_p9), 1043456   ;;  %vm383_vm4 = vcmask (!%p291_p9), 31744  }
  0x11   : > { %s3135_s17 = smov (!%p291_p9), 112   ;;  %v2739_v9 = vsub.s32 (!%p291_p9), 0, %v347_v7  ;;  %v2741_v10 = vsub.s32 (!%p291_p9), 1, %v347_v7  ;;  %vm341_vm0 = vcmp.lt.s32.totalorder (!%p291_p9), %v2737_v8, 17  ;;  %vm363_vm1 = vcmp.lt.s32.totalorder (!%p291_p9), %v2737_v8, 16  ;;  %s2428_s23 = sshll.u32 (!%p291_p9), %s2659_s13, 7 }
  0x12   : > { %vm549_vm3 = vcmp.lt.s32.totalorder (!%p291_p9), %v2737_v8, 15  ;;  %v2337_v31 = vld [vmem:[%s3124_s1 + $0x4] sm:$0xf] (!%p291_p9)  ;;  %v2354_v36 = vld [vmem:[%s3127_s4 + $0x8] sm:$0x3] (!%p291_p9)  ;;  %vm655_vm5 = vcmp.lt.s32.totalorder (!%p291_p9), %v2737_v8, 1 }
  0x13   : > { %v353_v15 = vrot.slane (!%p291_p9), %v344_v11, %v2741_v10  ;;  %v372_v16 = vrot.slane (!%p291_p9), %v2336_v12, %v2739_v9  ;;  %v376_v17 = vrot.slane (!%p291_p9), %v2336_v12, %v2741_v10  ;;  %v349_v18 = vrot.slane (!%p291_p9), %v344_v11, %v2739_v9  ;;  %v2349_v35 = vld [vmem:[%s3127_s4 + $0x6] sm:$0x3] (!%p291_p9)  ;;  %v358_v47 = vld [vmem:[%s3124_s1] sm:$0xf] (!%p291_p9)  ;;  %v2345_v54 = vld [vmem:[%s3124_s1 + $0x8] sm:$0xf] (!%p291_p9) }
  0x14   : > { %v562_v29 = vrot.slane (!%p291_p9), %v2344_v19, %v2741_v10  ;;  %v558_v38 = vrot.slane (!%p291_p9), %v2344_v19, %v2739_v9  ;;  %v668_v41 = vrot.slane (!%p291_p9), %v2349_v35, %v2741_v10  ;;  %v763_v43 = vrot.slane (!%p291_p9), %v2354_v36, %v2739_v9  ;;  %v2359_v56 = vld [vmem:[%s3127_s4 + $0xa] sm:$0x3] (!%p291_p9)  ;;  %v2350_v61 = vld [vmem:[%s3124_s1 + $0xc] sm:$0xf] (!%p291_p9) }
  0x15   : > { %s327_s21 = scalar_select %p326_p10, %s2659_s13, 1  ;;  %v767_v44 = vrot.slane %v2354_v36, %v2741_v10  ;;  %v664_v50 = vrot.slane %v2349_v35, %v2739_v9  ;;  %vm859_vm6 = vcmp.lt.s32.totalorder %v2737_v8, 127  ;;  %v872_v59 = vrot.slane %v2359_v56, %v2741_v10  ;;  %v2364_v63 = vld [vmem:[%s3127_s4 + $0xc] sm:$0x3] }
  0x16   : > { %vm965_vm7 = vcmp.lt.s32.totalorder %v2737_v8, 113  ;;  %v868_v5 = vrot.slane %v2359_v56, %v2739_v9  ;;  %v978_v7 = vrot.slane %v2364_v63, %v2741_v10  ;;  %vm1071_vm8 = vcmp.lt.s32.totalorder %v2737_v8, 112  ;;  %v1303_v56 = vld [vmem:[%s3131_s8] sm:$0x3]  ;;  %s2587_s13 = smov [#allocation2]  }
  0x17   : > { %s2427_s22 = sshll.u32 %s327_s21, 3  ;;  %s3133_s21 = smov 111   ;;  %v768_v49 = vcombine.low %v763_v43, %v767_v44  ;;  %vm1177_vm9 = vcmp.lt.s32.totalorder %v2737_v8, 111 }
  0x18   : > { %s330_s25 = scalar_lea.vmem %s3123_s0, %s2427_s22 }
  0x19   : > { %v2693_v1 = vld [vmem:[%s330_s25] sm:$0xff] }
  0x1a   : > { %335 = vrot.lane.b32.xlu1 %v2693_v1, %s2578_s26  ;;  %359 = vrot.lane.b32.xlu0 %v2693_v1, %s2579_s27  ;;  %v2701_v2 = vcombine.high %v2693_v1, %v2693_v1  ;;  %v770_v52 = vmul.f32 %v768_v49, %v2693_v1 }
  0x1c   : > { %v774_v55 = vcombine.high %v770_v52, %v770_v52 }
  0x1e   : > { %337 = vrot.lane.b32.xlu1 %v2701_v2, %s2578_s26  ;;  %361 = vrot.lane.b32.xlu0 %v2701_v2, %s2579_s27 }
  0x22   : > { %547 = vrot.lane.b32.xlu1 %v2701_v2, %s2580_s28  ;;  %545 = vrot.lane.b32.xlu0 %v2693_v1, %s2580_s28 }
  0x26   : > { %653 = vrot.lane.b32.xlu1 %v2701_v2, %s2581_s29  ;;  %651 = vrot.lane.b32.xlu0 %v2693_v1, %s2581_s29 }
  0x2a   : > { %857 = vrot.lane.b32.xlu1 %v2701_v2, %s2582_s14  ;;  %855 = vrot.lane.b32.xlu0 %v2693_v1, %s2582_s14 }
  0x2e   : > { %963 = vrot.lane.b32.xlu1 %v2701_v2, %s2583_s16  ;;  %961 = vrot.lane.b32.xlu0 %v2693_v1, %s2583_s16 }
  0x32   : > { %1069 = vrot.lane.b32.xlu1 %v2701_v2, %s3135_s17  ;;  %1067 = vrot.lane.b32.xlu0 %v2693_v1, %s3135_s17 }
  0x36   : > { %1175 = vrot.lane.b32.xlu1 %v2701_v2, %s3133_s21  ;;  %1173 = vrot.lane.b32.xlu0 %v2693_v1, %s3133_s21 }
  0x3a   : > { %1282 = vperm.xlu0 %2510, %v1279_v3   ;;  %1290 = vperm.xlu1 %2511, %v1287_v4  }
  0x8c   : > { %v336_v13 = vpop.permute.xlu1 %335  ;;  %v360_v14 = vpop.permute.xlu0 %359 }
  0x90   : > { %v338_v20 = vpop.permute.xlu1 %337  ;;  %v362_v21 = vpop.permute.xlu0 %361 }
  0x91   : > { %v342_v22 = vsel %vm341_vm0, %v336_v13, %v338_v20  ;;  %v343_v23 = vsel %vm341_vm0, %v338_v20, %v336_v13  ;;  %v364_v24 = vsel %vm363_vm1, %v360_v14, %v362_v21  ;;  %v365_v25 = vsel %vm363_vm1, %v362_v21, %v360_v14  ;;  %v2355_v13 = vld [vmem:[%s3124_s1 + $0x10] sm:$0xf] }
  0x92   : > { %v357_v26 = vmul.f32 %v353_v15, %v342_v22  ;;  %v379_v27 = vmul.f32 %v372_v16, %v365_v25  ;;  %v380_v28 = vmul.f32 %v376_v17, %v364_v24  ;;  %v356_v30 = vmul.f32 %v349_v18, %v343_v23  ;;  %v2369_v15 = vld [vmem:[%s3127_s4 + $0xe] sm:$0x3]  ;;  %v2360_v23 = vld [vmem:[%s3124_s1 + $0x14] sm:$0xf]  ;;  %v2374_v25 = vld [vmem:[%s3127_s4 + $0x10] sm:$0x3] }
  0x93   : > { %v974_v18 = vrot.slane %v2364_v63, %v2739_v9  ;;  %v1084_v20 = vrot.slane %v2369_v15, %v2741_v10  ;;  %v1186_v35 = vrot.slane %v2374_v25, %v2739_v9 }
  0x94   : > { %2338 = vmatprep.subr.msk.mxu0 %vm387_vm2, %v380_v28  ;;  %v548_v32 = vpop.permute.xlu1 %547  ;;  %v546_v33 = vpop.permute.xlu0 %545  ;;  %v1080_v28 = vrot.slane %v2369_v15, %v2739_v9 }
  0x95   : > { %2339 = vmatpush1.msk.msra.mxu0 %vm387_vm2, %v379_v27  ;;  %v550_v34 = vsel %vm549_vm3, %v546_v33, %v548_v32  ;;  %v551_v39 = vsel %vm549_vm3, %v548_v32, %v546_v33  ;;  %v2365_v33 = vld [vmem:[%s3124_s1 + $0x18] sm:$0xf] }
  0x96   : > { %2340 = vmatmul.mubr.msk.f32.vlgmr.msra.gmra.mrb[0].mxu0 %vm383_vm4, %v2337_v31  ;;  %2341 = vmatprep.subr.msk.mxu0 %vm387_vm2, %v357_v26  ;;  %v566_v37 = vmul.f32 %v562_v29, %v550_v34  ;;  %v565_v46 = vmul.f32 %v558_v38, %v551_v39  ;;  %v2370_v38 = vld [vmem:[%s3124_s1 + $0x1c] sm:$0xf]  ;;  %v2375_v39 = vld [vmem:[%s3124_s1 + $0x20] sm:$0xf] }
  0x97   : > { %2342 = vmatpush1.msk.msra.mxu0 %vm387_vm2, %v356_v30  ;;  %538 = vmatprep.mubr.f32.mxu0 %v2577_v0  ;;  %v1190_v30 = vrot.slane %v2374_v25, %v2741_v10 }
  0x98   : > { %2346 = vmatprep.subr.msk.mxu0 %vm387_vm2, %v566_v37  ;;  %v654_v40 = vpop.permute.xlu1 %653  ;;  %v652_v42 = vpop.permute.xlu0 %651 }
  0x99   : > { %v656_v45 = vsel %vm655_vm5, %v652_v42, %v654_v40  ;;  %v657_v51 = vsel %vm655_vm5, %v654_v40, %v652_v42 }
  0x9a   : > { %v672_v48 = vmul.f32 %v668_v41, %v656_v45  ;;  %v671_v53 = vmul.f32 %v664_v50, %v657_v51  ;;  %v2230_v50 = vld [vmem:[%s3129_s6] sm:$0xf] }
  0x9b   : > { %v2238_v51 = vld [vmem:[%s3130_s7] sm:$0xf] }
  0x9c   : > { %v858_v57 = vpop.permute.xlu1 %857  ;;  %v856_v58 = vpop.permute.xlu0 %855 }
  0x9d   : > { %v861_v60 = vsel %vm859_vm6, %v858_v57, %v856_v58  ;;  %v860_v6 = vsel %vm859_vm6, %v856_v58, %v858_v57 }
  0x9e   : > { %2343 = vmatmul.mubr.msk.f32.vlgmr.msra.gmra.mrb[0].mxu0 %vm383_vm4, %v358_v47  ;;  %v876_v62 = vmul.f32 %v872_v59, %v861_v60  ;;  %v875_v12 = vmul.f32 %v868_v5, %v860_v6  ;;  %v2387_v5 = vld [vmem:[%s3131_s8 + $0x4] sm:$0x3] }
  0x9f   : > { %2347 = vmatpush1.msk.msra.mxu0 %vm387_vm2, %v565_v46  ;;  %642 = vmatprep.mubr.f32.mxu0 %v2577_v0 }
  0xa0   : > { %2351 = vmatprep.subr.msk.mxu0 %vm387_vm2, %v672_v48  ;;  %v964_v3 = vpop.permute.xlu1 %963  ;;  %v962_v4 = vpop.permute.xlu0 %961 }
  0xa1   : > { %v967_v11 = vsel %vm965_vm7, %v964_v3, %v962_v4  ;;  %v966_v19 = vsel %vm965_vm7, %v962_v4, %v964_v3  ;;  %v2380_v4 = vld [vmem:[%s3128_s5 + $0x4] sm:$0xf] }
  0xa2   : > { %v982_v14 = vmul.f32 %v978_v7, %v967_v11  ;;  %v981_v22 = vmul.f32 %v974_v18, %v966_v19  ;;  %v1513_v18 = vrot.slane %v2387_v5, %v2739_v9 }
  0xa4   : > { %v1070_v16 = vpop.permute.xlu1 %1069  ;;  %v1068_v17 = vpop.permute.xlu0 %1067 }
  0xa5   : > { %v1073_v21 = vsel %vm1071_vm8, %v1070_v16, %v1068_v17  ;;  %v1072_v29 = vsel %vm1071_vm8, %v1068_v17, %v1070_v16  ;;  %v2392_v16 = vld [vmem:[%s3131_s8 + $0x6] sm:$0x3] }
  0xa6   : > { %2348 = vmatmul.mubr.msk.f32.vlgmr.msra.gmra.mrb[0].mxu0 %vm383_vm4, %v2345_v54  ;;  %v1088_v24 = vmul.f32 %v1084_v20, %v1073_v21  ;;  %v1087_v32 = vmul.f32 %v1080_v28, %v1072_v29  ;;  %v2397_v29 = vld [vmem:[%s3131_s8 + $0x8] sm:$0x3] }
  0xa7   : > { %2352 = vmatpush1.msk.msra.mxu0 %vm387_vm2, %v671_v53  ;;  %748 = vmatprep.mubr.f32.mxu0 %v2577_v0 }
  0xa8   : > { %2356 = vmatprep.subr.msk.mxu0 %vm387_vm2, %v774_v55  ;;  %v1176_v26 = vpop.permute.xlu1 %1175  ;;  %v1174_v27 = vpop.permute.xlu0 %1173 }
  0xa9   : > { %v1179_v31 = vsel %vm1177_vm9, %v1176_v26, %v1174_v27  ;;  %v1178_v36 = vsel %vm1177_vm9, %v1174_v27, %v1176_v26 }
  0xaa   : > { %v1194_v34 = vmul.f32 %v1190_v30, %v1179_v31  ;;  %v1193_v37 = vmul.f32 %v1186_v35, %v1178_v36  ;;  %v1618_v30 = vrot.slane %v2392_v16, %v2739_v9  ;;  %v2402_v36 = vld [vmem:[%s3131_s8 + $0xa] sm:$0x3] }
  0xae   : > { %2353 = vmatmul.mubr.msk.f32.vlgmr.msra.gmra.mrb[0].mxu0 %vm383_vm4, %v2350_v61  ;;  %v1308_v61 = vrot.slane %v1303_v56, %v2739_v9 }
  0xaf   : > { %2357 = vmatpush1.msk.msra.mxu0 %vm387_vm2, %v770_v52  ;;  %846 = vmatprep.mubr.f32.mxu0 %v2577_v0  ;;  %v2379_v52 = vld [vmem:[%s3131_s8 + $0x2] sm:$0x3] }
  0xb0   : > { %2361 = vmatprep.subr.msk.mxu0 %vm387_vm2, %v876_v62  ;;  %v1330_v53 = vrot.slane %v2379_v52, %v2739_v9  ;;  %v1334_v54 = vrot.slane %v2379_v52, %v2741_v10  ;;  %v1312_v62 = vrot.slane %v1303_v56, %v2741_v10  ;;  %v2398_v52 = vld [vmem:[%s3128_s5 + $0x10] sm:$0xf] }
  0xb6   : > { %2358 = vmatmul.mubr.msk.f32.vlgmr.msra.gmra.mrb[0].mxu0 %vm383_vm4, %v2355_v13 }
  0xb7   : > { %2362 = vmatpush1.msk.msra.mxu0 %vm387_vm2, %v875_v12  ;;  %952 = vmatprep.mubr.f32.mxu0 %v2577_v0 }
  0xb8   : > { %2366 = vmatprep.subr.msk.mxu0 %vm387_vm2, %v982_v14  ;;  %v1517_v14 = vrot.slane %v2387_v5, %v2741_v10 }
  0xb9   : > { %v1283_v40 = vpop.permute.xlu0 %1282  ;;  %v1291_v42 = vpop.permute.xlu1 %1290 }
  0xbe   : > { %2363 = vmatmul.mubr.msk.f32.vlgmr.msra.gmra.mrb[0].mxu0 %vm383_vm4, %v2360_v23 }
  0xbf   : > { %2367 = vmatpush1.msk.msra.mxu0 %vm387_vm2, %v981_v22  ;;  %1058 = vmatprep.mubr.f32.mxu0 %v2577_v0  ;;  %v1622_v22 = vrot.slane %v2392_v16, %v2741_v10 }
  0xc0   : > { %2371 = vmatprep.subr.msk.mxu0 %vm387_vm2, %v1088_v24  ;;  %v1317_v24 = vld [vmem:[%s3128_s5] sm:$0xf] }
  0xc6   : > { %2368 = vmatmul.mubr.msk.f32.vlgmr.msra.gmra.mrb[0].mxu0 %vm383_vm4, %v2365_v33  ;;  %v2388_v33 = vld [vmem:[%s3128_s5 + $0x8] sm:$0xf] }
  0xc7   : > { %2372 = vmatpush1.msk.msra.mxu0 %vm387_vm2, %v1087_v32  ;;  %1164 = vmatprep.mubr.f32.mxu0 %v2577_v0  ;;  %v1721_v32 = vrot.slane %v2397_v29, %v2741_v10 }
  0xc8   : > { %2376 = vmatprep.subr.msk.mxu0 %vm387_vm2, %v1194_v34 }
  0xce   : > { %2373 = vmatmul.mubr.msk.f32.vlgmr.msra.gmra.mrb[0].mxu0 %vm383_vm4, %v2370_v38 }
  0xcf   : > { %2377 = vmatpush1.msk.msra.mxu0 %vm387_vm2, %v1193_v37  ;;  %1270 = vmatprep.mubr.f32.mxu0 %v2577_v0 }
  0xd6   : > { %2378 = vmatmul.mubr.msk.f32.vlgmr.msra.gmra.mrb[0].mxu0 %vm383_vm4, %v2375_v39  ;;  %v1717_v39 = vrot.slane %v2397_v29, %v2739_v9 }
 0x1a9   : > { %v1272_v41 = vpop.f32.mrb[0].mxu0 }
 0x1aa   : > { %v1285_v43 = vmul.f32 %v1283_v40, %v1272_v41  ;;  %v1274_v44 = vpop.f32.mrb[1].mxu0 }
 0x1ab   : > { %v1286_v45 = vmul.f32 %v1283_v40, %v1274_v44  ;;  %v1826_v40 = vrot.slane %v2402_v36, %v2741_v10 }
 0x1ac   : > { %v1293_v46 = vadd.f32 %v1291_v42, %v1285_v43 }
 0x1ad   : > { %v1294_v47 = vadd.f32 %v1291_v42, %v1286_v45  ;;  %v2393_v42 = vld [vmem:[%s3128_s5 + $0xc] sm:$0xf] }
 0x1ae   : > { %v2891_v48 = vmax.f32 %v1293_v46, 0.0  ;;  %v2407_v45 = vld [vmem:[%s3131_s8 + $0xc] sm:$0x3] }
 0x1af   : > { %v2893_v49 = vmax.f32 %v1294_v47, 0.0 }
 0x1b0   : > { %1318 = vrot.lane.b32.xlu1 %v2891_v48, %s2579_s27  ;;  %v1724_v43 = vmul.f32 %v1717_v39, %v2891_v48 }
 0x1b1   : > { %1320 = vrot.lane.b32.xlu0 %v2893_v49, %s2579_s27  ;;  %s3140_s27 = smov 111   ;;  %v1725_v35 = vmul.f32 %v1721_v32, %v2893_v49 }
 0x1b4   : > { %1297 = vrot.lane.b32.xlu1 %v2891_v48, %s2578_s26 }
 0x1b5   : > { %1299 = vrot.lane.b32.xlu0 %v2893_v49, %s2578_s26  ;;  %s3139_s26 = smov 112  }
 0x1b8   : > { %1501 = vrot.lane.b32.xlu1 %v2891_v48, %s2580_s28 }
 0x1b9   : > { %1503 = vrot.lane.b32.xlu0 %v2893_v49, %s2580_s28 }
 0x1bc   : > { %1606 = vrot.lane.b32.xlu1 %v2891_v48, %s2581_s29 }
 0x1bd   : > { %1608 = vrot.lane.b32.xlu0 %v2893_v49, %s2581_s29 }
 0x1c0   : > { %1810 = vrot.lane.b32.xlu1 %v2891_v48, %s2582_s14 }
 0x1c1   : > { %1812 = vrot.lane.b32.xlu0 %v2893_v49, %s2582_s14  ;;  %s2517_s14 = sshll.u32 %s2587_s13, 4  ;;  %s2518_s14 = int_to_ptr.vmem [resolvable:$false] %s2517_s14 }
 0x1c2   : > { %s2519_s17 = scalar_lea.vmem %s2518_s14, 256 }
 0x1c4   : > { %1915 = vrot.lane.b32.xlu1 %v2891_v48, %s2583_s16 }
 0x1c5   : > { %1917 = vrot.lane.b32.xlu0 %v2893_v49, %s2583_s16  ;;  %s323_s16 = sand.u32 1, %s2567_s10  }
 0x1c6   : > { %s2333_s22 = sshll.u32 %s323_s16, 3  ;;  %s2256_s28 = scalar_lea.sflag [#allocation3], %s323_s16 }
 0x1c7   : > { %s325_s24 = scalar_lea.vmem [#allocation2], %s2333_s22 }
 0x1c8   : > { %2020 = vrot.lane.b32.xlu1 %v2891_v48, %s3139_s26  ;;  %s2270_s21 = sshll.u32 %s325_s24, 4  ;;  %s3083_s21 = int_to_ptr.vmem [resolvable:$true] %s2270_s21 }
 0x1c9   : > { %2022 = vrot.lane.b32.xlu0 %v2893_v49, %s3139_s26  ;;  %s2513_s29 = scalar_lea.vmem %s3083_s21, 128  ;;  %p2520_p0 = scmp.lt.s32.totalorder %s3083_s21, %s2518_s14 }
 0x1ca   : > { %p2514_p11 = scmp.ne.s32.totalorder %s3083_s21, %s2513_s29  ;;  %p2521_p1 = scmp.lt.s32.totalorder %s2519_s17, %s2513_s29 }
 0x1cc   : > { %2125 = vrot.lane.b32.xlu1 %v2891_v48, %s3140_s27  ;;  %p2515_p12 = pnand %p2514_p11, %p2676_p5  ;;  %p2522_p2 = por %p2521_p1, %p2520_p0 }
 0x1cd   : > { %2127 = vrot.lane.b32.xlu0 %v2893_v49, %s3140_s27  ;;  %v1822_v49 = vrot.slane %v2402_v36, %v2739_v9  ;;  %s3081_s27 = scalar_lea.hbm %s3132_s9, %s2428_s23 }
 0x1ce   : > { %p2516_p13 = pneg %p2515_p12 }
 0x1d0   : > { %2233 = vperm.xlu1 %2511, %v2230_v50   ;;  %v1931_v50 = vrot.slane %v2407_v45, %v2741_v10  ;;  %p2523_p3 = pnand %p2522_p2, %p2516_p13 }
 0x1d1   : > { %2241 = vperm.xlu0 %2510, %v2238_v51  }
 0x222   : > { %v1319_v55 = vpop.permute.xlu1 %1318 }
 0x223   : > { %v1321_v57 = vpop.permute.xlu0 %1320 }
 0x224   : > { %v1322_v58 = vsel %vm363_vm1, %v1319_v55, %v1321_v57  ;;  %v1323_v59 = vsel %vm363_vm1, %v1321_v57, %v1319_v55  ;;  %v2412_v55 = vld [vmem:[%s3131_s8 + $0xe] sm:$0x3] }
 0x225   : > { %v1337_v60 = vmul.f32 %v1330_v53, %v1323_v59  ;;  %v1338_v63 = vmul.f32 %v1334_v54, %v1322_v58  ;;  %v1927_v58 = vrot.slane %v2407_v45, %v2739_v9 }
 0x226   : > { %v1298_v3 = vpop.permute.xlu1 %1297 }
 0x227   : > { %v1300_v6 = vpop.permute.xlu0 %1299  ;;  %2381 = vmatprep.subr.msk.mxu1 %vm387_vm2, %v1338_v63 }
 0x228   : > { %v1301_v7 = vsel %vm341_vm0, %v1298_v3, %v1300_v6  ;;  %v1302_v11 = vsel %vm341_vm0, %v1300_v6, %v1298_v3  ;;  %2382 = vmatpush1.msk.msra.mxu1 %vm387_vm2, %v1337_v60  ;;  %v2036_v60 = vrot.slane %v2412_v55, %v2741_v10 }
 0x229   : > { %v1315_v12 = vmul.f32 %v1308_v61, %v1302_v11  ;;  %v1316_v13 = vmul.f32 %v1312_v62, %v1301_v7  ;;  %2383 = vmatmul.mubr.msk.f32.vlgmr.msra.gmra.mrb[0].mxu1 %vm383_vm4, %v2380_v4  ;;  %v2403_v62 = vld [vmem:[%s3128_s5 + $0x14] sm:$0xf]  ;;  %v2417_v4 = vld [vmem:[%s3131_s8 + $0x10] sm:$0x3]  ;;  %v2032_v7 = vrot.slane %v2412_v55, %v2739_v9 }
 0x22a   : > { %v1502_v15 = vpop.permute.xlu1 %1501  ;;  %1494 = vmatprep.mubr.f32.mxu1 %v2577_v0 }
 0x22b   : > { %v1504_v17 = vpop.permute.xlu0 %1503  ;;  %2384 = vmatprep.subr.msk.mxu1 %vm387_vm2, %v1316_v13 }
 0x22c   : > { %v1505_v19 = vsel %vm549_vm3, %v1502_v15, %v1504_v17  ;;  %2385 = vmatpush1.msk.msra.mxu1 %vm387_vm2, %v1315_v12  ;;  %v1506_v20 = vsel %vm549_vm3, %v1504_v17, %v1502_v15  ;;  %v2141_v12 = vrot.slane %v2417_v4, %v2741_v10  ;;  %v2137_v10 = vrot.slane %v2417_v4, %v2739_v9 }
 0x22d   : > { %v1521_v21 = vmul.f32 %v1517_v14, %v1505_v19  ;;  %v1520_v26 = vmul.f32 %v1513_v18, %v1506_v20  ;;  %v2408_v14 = vld [vmem:[%s3128_s5 + $0x18] sm:$0xf]  ;;  %v2413_v18 = vld [vmem:[%s3128_s5 + $0x1c] sm:$0xf]  ;;  %v2418_v20 = vld [vmem:[%s3128_s5 + $0x20] sm:$0xf] }
 0x22e   : > { %v1607_v23 = vpop.permute.xlu1 %1606 }
 0x22f   : > { %v1609_v25 = vpop.permute.xlu0 %1608  ;;  %2389 = vmatprep.subr.msk.mxu1 %vm387_vm2, %v1521_v21 }
 0x230   : > { %v1610_v27 = vsel %vm655_vm5, %v1607_v23, %v1609_v25  ;;  %v1611_v31 = vsel %vm655_vm5, %v1609_v25, %v1607_v23 }
 0x231   : > { %v1626_v28 = vmul.f32 %v1622_v22, %v1610_v27  ;;  %2386 = vmatmul.mubr.msk.f32.vlgmr.msra.gmra.mrb[0].mxu1 %vm383_vm4, %v1317_v24  ;;  %v1625_v34 = vmul.f32 %v1618_v30, %v1611_v31 }
 0x232   : > { %2390 = vmatpush1.msk.msra.mxu1 %vm387_vm2, %v1520_v26  ;;  %1597 = vmatprep.mubr.f32.mxu1 %v2577_v0  ;;  %v1811_v37 = vpop.permute.xlu1 %1810 }
 0x233   : > { %2394 = vmatprep.subr.msk.mxu1 %vm387_vm2, %v1626_v28  ;;  %v1813_v38 = vpop.permute.xlu0 %1812 }
 0x234   : > { %v1815_v41 = vsel %vm859_vm6, %v1813_v38, %v1811_v37  ;;  %v1814_v48 = vsel %vm859_vm6, %v1811_v37, %v1813_v38 }
 0x235   : > { %v1830_v44 = vmul.f32 %v1826_v40, %v1815_v41  ;;  %v1829_v53 = vmul.f32 %v1822_v49, %v1814_v48 }
 0x236   : > { %v1916_v46 = vpop.permute.xlu1 %1915 }
 0x237   : > { %v1918_v47 = vpop.permute.xlu0 %1917 }
 0x238   : > { %v1920_v51 = vsel %vm965_vm7, %v1918_v47, %v1916_v46  ;;  %v1919_v59 = vsel %vm965_vm7, %v1916_v46, %v1918_v47 }
 0x239   : > { %2391 = vmatmul.mubr.msk.f32.vlgmr.msra.gmra.mrb[0].mxu1 %vm383_vm4, %v2388_v33  ;;  %v1935_v54 = vmul.f32 %v1931_v50, %v1920_v51  ;;  %v1934_v63 = vmul.f32 %v1927_v58, %v1919_v59 }
 0x23a   : > { %2395 = vmatpush1.msk.msra.mxu1 %vm387_vm2, %v1625_v34  ;;  %1702 = vmatprep.mubr.f32.mxu1 %v2577_v0  ;;  %v2021_v56 = vpop.permute.xlu1 %2020 }
 0x23b   : > { %2399 = vmatprep.subr.msk.mxu1 %vm387_vm2, %v1725_v35  ;;  %v2023_v57 = vpop.permute.xlu0 %2022 }
 0x23c   : > { %v2025_v61 = vsel %vm1071_vm8, %v2023_v57, %v2021_v56  ;;  %v2024_v11 = vsel %vm1071_vm8, %v2021_v56, %v2023_v57 }
 0x23d   : > { %v2040_v3 = vmul.f32 %v2036_v60, %v2025_v61  ;;  %v2039_v15 = vmul.f32 %v2032_v7, %v2024_v11 }
 0x23e   : > { %v2126_v5 = vpop.permute.xlu1 %2125 }
 0x23f   : > { %v2128_v6 = vpop.permute.xlu0 %2127 }
 0x240   : > { %v2130_v13 = vsel %vm1177_vm9, %v2128_v6, %v2126_v5  ;;  %v2129_v17 = vsel %vm1177_vm9, %v2126_v5, %v2128_v6 }
 0x241   : > { %2396 = vmatmul.mubr.msk.f32.vlgmr.msra.gmra.mrb[0].mxu1 %vm383_vm4, %v2393_v42  ;;  %v2145_v16 = vmul.f32 %v2141_v12, %v2130_v13  ;;  %v2144_v19 = vmul.f32 %v2137_v10, %v2129_v17 }
 0x242   : > { %2400 = vmatpush1.msk.msra.mxu1 %vm387_vm2, %v1724_v43  ;;  %1801 = vmatprep.mubr.f32.mxu1 %v2577_v0 }
 0x243   : > { %2404 = vmatprep.subr.msk.mxu1 %vm387_vm2, %v1830_v44 }
 0x249   : > { %2401 = vmatmul.mubr.msk.f32.vlgmr.msra.gmra.mrb[0].mxu1 %vm383_vm4, %v2398_v52 }
 0x24a   : > { %2405 = vmatpush1.msk.msra.mxu1 %vm387_vm2, %v1829_v53  ;;  %1906 = vmatprep.mubr.f32.mxu1 %v2577_v0 }
 0x24b   : > { %2409 = vmatprep.subr.msk.mxu1 %vm387_vm2, %v1935_v54 }
 0x24f   : > { %v2234_v8 = vpop.permute.xlu1 %2233 }
 0x250   : > { %v2242_v23 = vpop.permute.xlu0 %2241 }
 0x251   : > { %2406 = vmatmul.mubr.msk.f32.vlgmr.msra.gmra.mrb[0].mxu1 %vm383_vm4, %v2403_v62 }
 0x252   : > { %2410 = vmatpush1.msk.msra.mxu1 %vm387_vm2, %v1934_v63  ;;  %2011 = vmatprep.mubr.f32.mxu1 %v2577_v0 }
 0x253   : > { %2414 = vmatprep.subr.msk.mxu1 %vm387_vm2, %v2040_v3 }
 0x259   : > { %2411 = vmatmul.mubr.msk.f32.vlgmr.msra.gmra.mrb[0].mxu1 %vm383_vm4, %v2408_v14 }
 0x25a   : > { %2415 = vmatpush1.msk.msra.mxu1 %vm387_vm2, %v2039_v15  ;;  %2116 = vmatprep.mubr.f32.mxu1 %v2577_v0 }
 0x25b   : > { %2419 = vmatprep.subr.msk.mxu1 %vm387_vm2, %v2145_v16 }
 0x261   : > { %2416 = vmatmul.mubr.msk.f32.vlgmr.msra.gmra.mrb[0].mxu1 %vm383_vm4, %v2413_v18 }
 0x262   : > { %2420 = vmatpush1.msk.msra.mxu1 %vm387_vm2, %v2144_v19  ;;  %2221 = vmatprep.mubr.f32.mxu1 %v2577_v0 }
 0x269   : > { %2421 = vmatmul.mubr.msk.f32.vlgmr.msra.gmra.mrb[0].mxu1 %vm383_vm4, %v2418_v20 }
 0x33c   : > { %v2223_v9 = vpop.f32.mrb[0].mxu1 }
 0x33d   : > { %v2236_v21 = vmul.f32 %v2234_v8, %v2223_v9  ;;  %v2225_v22 = vpop.f32.mrb[1].mxu1 }
 0x33e   : > { %v2237_v24 = vmul.f32 %v2234_v8, %v2225_v22 }
 0x33f   : > { %v2244_v25 = vadd.f32 %v2242_v23, %v2236_v21 }
 0x340   : > { %v2245_v26 = vadd.f32 %v2242_v23, %v2237_v24 }
 0x341   : > { %v2246_v0 = vadd.f32 %v2244_v25, %v2693_v1 }
 0x342   : > { %v2247_v27 = vadd.f32 %v2245_v26, %v2701_v2 }
 0x343   : > { %v2248_v28 = vmax.f32 %v2246_v0, 0.0 }
 0x344   : > { %v2249_v29 = vmax.f32 %v2247_v27, 0.0 }
 0x346   : > { %v2252_v30 = vcombine.low %v2248_v28, %v2249_v29 }
 0x348   : > { %2254 = vst [vmem:[%s325_s24] sm:$0xff] %v2252_v30 }
 0x349   : > { %2526 = shalt.err (!%p2523_p3)
}
 0x34a   : > { %s2527_s16 = scalar_lea.hbm %s3081_s27, 128  ;;  %s2531_s24 = scalar_lea.hbm %s3132_s9, 256 }
 0x34b   : > { %p2528_p4 = scmp.ne.s32.totalorder %s3081_s27, %s2527_s16  ;;  %p2532_p9 = scmp.lt.u32.totalorder %s3081_s27, %s3132_s9 }
 0x34c   : > { %p2533_p10 = scmp.lt.u32.totalorder %s2531_s24, %s2527_s16  ;;  %p2535_p12 = scmp.lt.u32.totalorder %s2527_s16, %s3081_s27 }
 0x34d   : > { %p2529_p7 = pnand %p2528_p4, %p2676_p5 }
 0x34e   : > { %p2534_p11 = por %p2533_p10, %p2532_p9 }
 0x34f   : > { %p2530_p8 = pneg %p2529_p7 }
 0x350   : > { %p2536_p13 = por %p2535_p12, %p2534_p11 }
 0x352   : > { %p2537_p0 = pnand %p2536_p13, %p2530_p8 }
 0x354   : > { %2540 = shalt.err (!%p2537_p0)
}
 0x355   : > { %2461 = dma.vmem_to_hbm [thread:$0]  (%p2676_p5), %s3083_s21, 128, %s3081_s27, %s2256_s28  }
 0x356 PF: > { %p2467_p1 = scmp.ge.s32.totalorder %s2575_s12, 2  ;;  %s2282_s29 = sand.u32 1, %s2563_s30  }
 0x357   : > { %s2283_s13 = scalar_lea.sflag [#allocation3], %s2282_s29 }
 0x358   : > { %p2464_p2 = pnand %p2467_p1, %p2680_p6 }
 0x35a   : > { %2558 = dma.done.wait (!%p2464_p2), %s2283_s13, 128  }
 0x35b   : > { %2560 = vsyncadd (!%p2464_p2), %s2283_s13, 4294967168  ;;  %p19_p3 = scmp.ge.s32.totalorder %s2663_s15, 4   ;;  %s3141_s30 = smov %s2567_s10 }
 0x35c   : > { %s3142_s10 = smov %s2571_s11  ;;  %s3143_s11 = smov %s2674_s18 }
 0x35d   : > { %s3144_s12 = smov %s2663_s15  ;;  %21 = sbr.rel (!%p19_p3) target bundleno = 3 (0x3), region = 123 }
 0x364   :  { %2288 = vsyncpa [#allocation3], 1 }
 0x365   :  { %2290 = vsyncpa [#allocation3 + $0x1], 1 }

</bundles_post_ra>
